<compile_context>
chip_gen: v5e
topology: v5e:2x2
jax: 0.10.0
libtpu: 0.0.40
codegen_flags: <defaults>
</compile_context>

<pallas_src>
import math

import jax
import jax.numpy as jnp
from jax.experimental import pallas as pl
from jax.experimental.pallas import tpu as pltpu

HIDDEN = 256          # fixed by the module definition
LANES = 128
MAX_BATCH_TILE = 512  # rows per grid step; safe for the 64 MiB v7x VMEM


def _round_up(x, m):
    return ((x + m - 1) // m) * m


def critic_kernel(s_ref, a_ref, w1_ref, b1_ref, w2a_ref, b2a_ref,
                  w3_ref, b3_ref, o_ref, xa_ref):
    # ---- fc1 + relu: bf16 MXU operands, f32 accumulate, f32 epilogue ----
    x = jnp.dot(s_ref[...].astype(jnp.bfloat16), w1_ref[...],
                preferred_element_type=jnp.float32)
    x = jnp.maximum(x + b1_ref[...], 0.0)

    # ---- pack [x, action_pad] into the fused-K operand (bf16 scratch) ----
    xa_ref[:, :HIDDEN] = x.astype(jnp.bfloat16)
    xa_ref[:, HIDDEN:] = a_ref[...].astype(jnp.bfloat16)

    # ---- fused fc2 + fc_action: single MXU matmul, add/relu in f32 ----
    h = jnp.dot(xa_ref[...], w2a_ref[...], preferred_element_type=jnp.float32)
    h = jnp.maximum(h + b2a_ref[...], 0.0)

    # ---- fc3 head (N=1): VPU multiply + XLU lane reduce; b3 from SMEM ----
    q = jnp.sum(h * w3_ref[...], axis=-1, keepdims=True) + b3_ref[0]
    o_ref[...] = q.astype(o_ref.dtype)


def critic_forward(state, action, params, *, max_tile=MAX_BATCH_TILE):
    """state: (B, state_dim) f32, action: (B, action_dim) f32 -> (B, 1) f32."""
    w1, b1, w2, b2, wa, ba, w3, b3 = params
    B, state_dim = state.shape
    action_dim = action.shape[1]

    # --- tiling over the batch ---
    tb = min(max_tile, _round_up(B, 8))
    b_pad = _round_up(B, tb)
    grid = (b_pad // tb,)

    # --- pad batch rows; pad action feature dim to a lane multiple ---
    a_pad = _round_up(action_dim, LANES)
    state_p = jnp.zeros((b_pad, state_dim), jnp.float32).at[:B].set(state)
    action_p = jnp.zeros((b_pad, a_pad), jnp.float32).at[:B, :action_dim].set(action)

    # --- fuse fc2 + fc_action weights; bf16 MXU operands, f32 biases ---
    wa_p = jnp.zeros((a_pad, HIDDEN), jnp.float32).at[:action_dim].set(wa)
    w2a = jnp.concatenate([w2, wa_p], axis=0).astype(jnp.bfloat16)   # (256+a_pad, 256)
    w1_bf = w1.astype(jnp.bfloat16)                                  # (state_dim, 256)
    b2a = (b2 + ba).astype(jnp.float32)                              # (1, 256)
    w3_row = w3.reshape(1, HIDDEN).astype(jnp.float32)               # (1, 256)
    b3_s = b3.reshape(1).astype(jnp.float32)                         # (1,) scalar -> SMEM

    k_fused = HIDDEN + a_pad

    cost = pl.CostEstimate(
        flops=2 * b_pad * (state_dim * HIDDEN + k_fused * HIDDEN + HIDDEN),
        transcendentals=0,
        bytes_accessed=(state_dim * HIDDEN * 2 + k_fused * HIDDEN * 2
                        + (2 * HIDDEN + HIDDEN + 1) * 4
                        + b_pad * (state_dim + a_pad + 1) * 4),
    )

    out = pl.pallas_call(
        critic_kernel,
        out_shape=jax.ShapeDtypeStruct((b_pad, 1), jnp.float32),
        grid_spec=pltpu.PrefetchScalarGridSpec(
            num_scalar_prefetch=0,
            grid=grid,
            in_specs=[
                pl.BlockSpec((tb, state_dim), lambda i: (i, 0)),      # state tile
                pl.BlockSpec((tb, a_pad), lambda i: (i, 0)),          # action tile
                pl.BlockSpec((state_dim, HIDDEN), lambda i: (0, 0)),  # W1 (resident)
                pl.BlockSpec((1, HIDDEN), lambda i: (0, 0)),          # b1
                pl.BlockSpec((k_fused, HIDDEN), lambda i: (0, 0)),    # [W2; Wa]
                pl.BlockSpec((1, HIDDEN), lambda i: (0, 0)),          # b2 + ba
                pl.BlockSpec((1, HIDDEN), lambda i: (0, 0)),          # w3 row
                pl.BlockSpec(memory_space=pltpu.MemorySpace.SMEM),    # b3 scalar
            ],
            out_specs=pl.BlockSpec((tb, 1), lambda i: (i, 0)),
            scratch_shapes=[pltpu.VMEM((tb, k_fused), jnp.bfloat16)],
        ),
        compiler_params=pltpu.CompilerParams(
            dimension_semantics=("parallel",)),
        cost_estimate=cost,
    )(state_p, action_p, w1_bf, b1, w2a, b2a, w3_row, b3_s)

    return out[:B]


def init_params(key, state_dim, action_dim):
    """Deterministic init mirroring the PyTorch module's __init__.

    fanin_init uses v = 1/sqrt(weight.size(0)) = 1/sqrt(out_features) = 1/16
    for fc1, fc2, fc_action; fc3 weight is uniform(-0.003, 0.003).
    Biases use PyTorch's default Linear init: uniform(-1/sqrt(in), 1/sqrt(in)).
    Weights are created directly in (in_features, out_features) layout.
    """
    ks = jax.random.split(key, 8)
    v = 1.0 / math.sqrt(HIDDEN)

    def u(k, shape, lo, hi):
        return jax.random.uniform(k, shape, jnp.float32, lo, hi)

    w1 = u(ks[0], (state_dim, HIDDEN), -v, v)
    b1 = u(ks[1], (1, HIDDEN), -1.0 / math.sqrt(state_dim), 1.0 / math.sqrt(state_dim))
    w2 = u(ks[2], (HIDDEN, HIDDEN), -v, v)
    b2 = u(ks[3], (1, HIDDEN), -1.0 / math.sqrt(HIDDEN), 1.0 / math.sqrt(HIDDEN))
    wa = u(ks[4], (action_dim, HIDDEN), -v, v)
    ba = u(ks[5], (1, HIDDEN), -1.0 / math.sqrt(action_dim), 1.0 / math.sqrt(action_dim))
    w3 = u(ks[6], (HIDDEN, 1), -0.003, 0.003)
    b3 = u(ks[7], (1, 1), -1.0 / math.sqrt(HIDDEN), 1.0 / math.sqrt(HIDDEN))
    return (w1, b1, w2, b2, wa, ba, w3, b3)


def critic_ref(state, action, params):
    """Plain-JAX f32 reference for correctness checking."""
    (w1, b1, w2, b2, wa, ba, w3, b3) = params
    x = jnp.maximum(state @ w1 + b1, 0.0)
    x_state = x @ w2 + b2
    x_action = action @ wa + ba
    h = jnp.maximum(x_state + x_action, 0.0)
    return h @ w3 + b3


if __name__ == "__main__":
    B, state_dim, action_dim = 8, 32, 8

    key = jax.random.PRNGKey(0)
    k_params, k_state, k_action = jax.random.split(key, 3)

    params = init_params(k_params, state_dim, action_dim)
    state = jax.random.normal(k_state, (B, state_dim), jnp.float32)
    action = jax.random.normal(k_action, (B, action_dim), jnp.float32)

    q = critic_forward(state, action, params)
    q = jax.block_until_ready(q)

    q_ref = critic_ref(state, action, params)
    assert q.shape == (B, 1), q.shape
    # bf16 MXU operands with f32 accumulation -> loosened tolerance vs f32 ref.
    assert jnp.allclose(q, q_ref, atol=2e-3, rtol=2e-2), (q, q_ref)

    print("KERNEL_OK")
</pallas_src>

<mosaic_0001>
module attributes {stable_mosaic.version = 11 : i64} {
  func.func @critic_kernel(%arg0: i32, %arg1: memref<8x32xf32, #tpu.memory_space<vmem>>, %arg2: memref<8x128xf32, #tpu.memory_space<vmem>>, %arg3: memref<32x256xbf16, #tpu.memory_space<vmem>>, %arg4: memref<1x256xf32, #tpu.memory_space<vmem>>, %arg5: memref<384x256xbf16, #tpu.memory_space<vmem>>, %arg6: memref<1x256xf32, #tpu.memory_space<vmem>>, %arg7: memref<1x256xf32, #tpu.memory_space<vmem>>, %arg8: memref<1xf32, #tpu.memory_space<smem>>, %arg9: memref<8x1xf32, #tpu.memory_space<vmem>>, %arg10: memref<8x384xbf16, #tpu.memory_space<vmem>>) attributes {dimension_semantics = [#tpu.dimension_semantics<parallel>], iteration_bounds = array<i64: 1>, scalar_prefetch = 0 : i64, scratch_operands = 1 : i64, tpu.core_type = #tpu.core_type<tc>, window_params = [{transform_indices = @transform_0, window_bounds = array<i64: 8, 32>}, {transform_indices = @transform_1, window_bounds = array<i64: 8, 128>}, {pipeline_mode = #tpu.pipeline_mode<synchronous>, transform_indices = @transform_2, window_bounds = array<i64: 32, 256>}, {pipeline_mode = #tpu.pipeline_mode<synchronous>, transform_indices = @transform_3, window_bounds = array<i64: 1, 256>}, {pipeline_mode = #tpu.pipeline_mode<synchronous>, transform_indices = @transform_4, window_bounds = array<i64: 384, 256>}, {pipeline_mode = #tpu.pipeline_mode<synchronous>, transform_indices = @transform_5, window_bounds = array<i64: 1, 256>}, {pipeline_mode = #tpu.pipeline_mode<synchronous>, transform_indices = @transform_6, window_bounds = array<i64: 1, 256>}, {transform_indices = @transform_7, window_bounds = array<i64: 1>}, {transform_indices = @transform_8, window_bounds = array<i64: 8, 1>}]} {
    %c0 = arith.constant 0 : index
    %c0_0 = arith.constant 0 : index
    %0 = vector.load %arg1[%c0, %c0_0] : memref<8x32xf32, #tpu.memory_space<vmem>>, vector<8x32xf32>
    %1 = arith.truncf %0 : vector<8x32xf32> to vector<8x32xbf16>
    %c0_1 = arith.constant 0 : index
    %c0_2 = arith.constant 0 : index
    %2 = vector.load %arg3[%c0_1, %c0_2] : memref<32x256xbf16, #tpu.memory_space<vmem>>, vector<32x256xbf16>
    %cst = arith.constant dense<0.000000e+00> : vector<8x256xf32>
    %3 = tpu.matmul %1, %2, %cst {dimension_numbers = #tpu.dot_dimension_numbers<[1], [0], [0], [1], [0, 0, 1, 1], [], []>} : vector<8x32xbf16>, vector<32x256xbf16>, vector<8x256xf32> -> vector<8x256xf32>
    %c0_3 = arith.constant 0 : index
    %c0_4 = arith.constant 0 : index
    %4 = vector.load %arg4[%c0_3, %c0_4] : memref<1x256xf32, #tpu.memory_space<vmem>>, vector<1x256xf32>
    %5 = vector.broadcast %4 : vector<1x256xf32> to vector<8x256xf32>
    %6 = arith.addf %3, %5 : vector<8x256xf32>
    %cst_5 = arith.constant 0.000000e+00 : f32
    %7 = vector.broadcast %cst_5 : f32 to vector<8x256xf32>
    %8 = arith.maximumf %6, %7 : vector<8x256xf32>
    %9 = arith.truncf %8 : vector<8x256xf32> to vector<8x256xbf16>
    %c0_6 = arith.constant 0 : index
    %c0_7 = arith.constant 0 : index
    %10 = vector.load %arg10[%c0_6, %c0_7] : memref<8x384xbf16, #tpu.memory_space<vmem>>, vector<8x256xbf16>
    tpu.vector_store %arg10[%c0_6, %c0_7], %9 {strides = array<i32>} : memref<8x384xbf16, #tpu.memory_space<vmem>>, vector<8x256xbf16>,
    %c0_8 = arith.constant 0 : index
    %c0_9 = arith.constant 0 : index
    %11 = vector.load %arg2[%c0_8, %c0_9] : memref<8x128xf32, #tpu.memory_space<vmem>>, vector<8x128xf32>
    %12 = arith.truncf %11 : vector<8x128xf32> to vector<8x128xbf16>
    %c0_10 = arith.constant 0 : index
    %c256 = arith.constant 256 : index
    %13 = vector.load %arg10[%c0_10, %c256] : memref<8x384xbf16, #tpu.memory_space<vmem>>, vector<8x128xbf16>
    tpu.vector_store %arg10[%c0_10, %c256], %12 {strides = array<i32>} : memref<8x384xbf16, #tpu.memory_space<vmem>>, vector<8x128xbf16>,
    %c0_11 = arith.constant 0 : index
    %c0_12 = arith.constant 0 : index
    %14 = vector.load %arg10[%c0_11, %c0_12] : memref<8x384xbf16, #tpu.memory_space<vmem>>, vector<8x384xbf16>
    %c0_13 = arith.constant 0 : index
    %c0_14 = arith.constant 0 : index
    %15 = vector.load %arg5[%c0_13, %c0_14] : memref<384x256xbf16, #tpu.memory_space<vmem>>, vector<384x256xbf16>
    %cst_15 = arith.constant dense<0.000000e+00> : vector<8x256xf32>
    %16 = tpu.matmul %14, %15, %cst_15 {dimension_numbers = #tpu.dot_dimension_numbers<[1], [0], [0], [1], [0, 0, 1, 1], [], []>} : vector<8x384xbf16>, vector<384x256xbf16>, vector<8x256xf32> -> vector<8x256xf32>
    %c0_16 = arith.constant 0 : index
    %c0_17 = arith.constant 0 : index
    %17 = vector.load %arg6[%c0_16, %c0_17] : memref<1x256xf32, #tpu.memory_space<vmem>>, vector<1x256xf32>
    %18 = vector.broadcast %17 : vector<1x256xf32> to vector<8x256xf32>
    %19 = arith.addf %16, %18 : vector<8x256xf32>
    %cst_18 = arith.constant 0.000000e+00 : f32
    %20 = vector.broadcast %cst_18 : f32 to vector<8x256xf32>
    %21 = arith.maximumf %19, %20 : vector<8x256xf32>
    %c0_19 = arith.constant 0 : index
    %c0_20 = arith.constant 0 : index
    %22 = vector.load %arg7[%c0_19, %c0_20] : memref<1x256xf32, #tpu.memory_space<vmem>>, vector<1x256xf32>
    %23 = vector.broadcast %22 : vector<1x256xf32> to vector<8x256xf32>
    %24 = arith.mulf %21, %23 : vector<8x256xf32>
    %cst_21 = arith.constant dense<0.000000e+00> : vector<8xf32>
    %25 = vector.multi_reduction <add>, %24, %cst_21 [1] : vector<8x256xf32> to vector<8xf32>
    %26 = vector.shape_cast %25 : vector<8xf32> to vector<8x1xf32>
    %c0_22 = arith.constant 0 : index
    %27 = memref.load %arg8[%c0_22] : memref<1xf32, #tpu.memory_space<smem>>
    %28 = vector.broadcast %27 : f32 to vector<8x1xf32>
    %29 = arith.addf %26, %28 : vector<8x1xf32>
    %c0_23 = arith.constant 0 : index
    %c0_24 = arith.constant 0 : index
    %30 = vector.load %arg9[%c0_23, %c0_24] : memref<8x1xf32, #tpu.memory_space<vmem>>, vector<8x1xf32>
    tpu.vector_store %arg9[%c0_23, %c0_24], %29 {strides = array<i32>} : memref<8x1xf32, #tpu.memory_space<vmem>>, vector<8x1xf32>,
    return
  }
  func.func @transform_0(%arg0: i32) -> (i32, i32) {
    %c0_i32 = arith.constant 0 : i32
    %c0_i32_0 = arith.constant 0 : i32
    return %arg0, %c0_i32 : i32, i32
  }
  func.func @transform_1(%arg0: i32) -> (i32, i32) {
    %c0_i32 = arith.constant 0 : i32
    %c0_i32_0 = arith.constant 0 : i32
    return %arg0, %c0_i32 : i32, i32
  }
  func.func @transform_2(%arg0: i32) -> (i32, i32) {
    %c0_i32 = arith.constant 0 : i32
    %c0_i32_0 = arith.constant 0 : i32
    %c0_i32_1 = arith.constant 0 : i32
    return %c0_i32, %c0_i32_0 : i32, i32
  }
  func.func @transform_3(%arg0: i32) -> (i32, i32) {
    %c0_i32 = arith.constant 0 : i32
    %c0_i32_0 = arith.constant 0 : i32
    %c0_i32_1 = arith.constant 0 : i32
    return %c0_i32, %c0_i32_0 : i32, i32
  }
  func.func @transform_4(%arg0: i32) -> (i32, i32) {
    %c0_i32 = arith.constant 0 : i32
    %c0_i32_0 = arith.constant 0 : i32
    %c0_i32_1 = arith.constant 0 : i32
    return %c0_i32, %c0_i32_0 : i32, i32
  }
  func.func @transform_5(%arg0: i32) -> (i32, i32) {
    %c0_i32 = arith.constant 0 : i32
    %c0_i32_0 = arith.constant 0 : i32
    %c0_i32_1 = arith.constant 0 : i32
    return %c0_i32, %c0_i32_0 : i32, i32
  }
  func.func @transform_6(%arg0: i32) -> (i32, i32) {
    %c0_i32 = arith.constant 0 : i32
    %c0_i32_0 = arith.constant 0 : i32
    %c0_i32_1 = arith.constant 0 : i32
    return %c0_i32, %c0_i32_0 : i32, i32
  }
  func.func @transform_7(%arg0: i32) -> i32 {
    %c0_i32 = arith.constant 0 : i32
    %c0_i32_0 = arith.constant 0 : i32
    return %c0_i32 : i32
  }
  func.func @transform_8(%arg0: i32) -> (i32, i32) {
    %c0_i32 = arith.constant 0 : i32
    %c0_i32_0 = arith.constant 0 : i32
    return %arg0, %c0_i32 : i32, i32
  }
}

</mosaic_0001>

<bundles_post_ra>
// kernel: tpu_custom_call.1
= control target key start
LH: loop header
LB: loop body
LE: loop exit
PB: predicated region body
PF: predicated region fallthrough
CT: control target
= control target key end

     0   :  { %14 = vsyncpa [#allocation5], 0  ;;  %s1019_s0 = inlined_call_operand.hbm [shape: f32[8,32], index: 0, kind: input, shape index: {}]   ;;  %s1020_s1 = inlined_call_operand.hbm [shape: f32[8,128], index: 1, kind: input, shape index: {}]   ;;  %s1021_s2 = inlined_call_operand.hbm [shape: bf16[32,256], index: 2, kind: input, shape index: {}]   ;;  %s1022_s3 = inlined_call_operand.vmem [shape: f32[1,256], index: 3, kind: input, shape index: {}]   ;;  %s1023_s4 = inlined_call_operand.hbm [shape: bf16[384,256], index: 4, kind: input, shape index: {}]   ;;  %s1024_s5 = inlined_call_operand.vmem [shape: f32[1,256], index: 5, kind: input, shape index: {}]   ;;  %s1025_s6 = inlined_call_operand.vmem [shape: f32[1,256], index: 6, kind: input, shape index: {}]   ;;  %s1026_s7 = inlined_call_operand.<no memory space> [shape: f32[1], index: 7, kind: input, shape index: {}]   ;;  %s1027_s8 = inlined_call_operand.vmem [shape: f32[8,1], index: 8, kind: output, shape index: {}]  }
   0x1   :  { %15 = vsyncpa [#allocation7], 0  ;;  %s33_s29 = sshll.u32 %s1020_s1, 4  ;;  %s34_s29 = int_to_ptr.hbm [resolvable:$true] %s33_s29 }
   0x2   :  { %16 = vsyncpa [#allocation10], 0  ;;  %s939_s30 = smov [#allocation6]   ;;  %s22_s12 = sshll.u32 %s1019_s0, 4  ;;  %s23_s12 = int_to_ptr.hbm [resolvable:$true] %s22_s12 }
   0x3   :  { %s35_s9 = sshll.u32 %s939_s30, 4  ;;  %s940_s13 = smov [#allocation4]   ;;  %s36_s9 = int_to_ptr.vmem [resolvable:$true] %s35_s9 }
   0x4   :  { %38 = dma.hbm_to_vmem [thread:$0]  %s34_s29, 128, %s36_s9, [#allocation7]  }
   0x5   :  { %s24_s14 = sshll.u32 %s940_s13, 4  ;;  %s43_s17 = sshll.u32 %s1021_s2, 4  ;;  %s25_s14 = int_to_ptr.vmem [resolvable:$true] %s24_s14  ;;  %s44_s17 = int_to_ptr.hbm [resolvable:$true] %s43_s17 }
   0x6   :  { %27 = dma.hbm_to_vmem [thread:$0]  %s23_s12, 128, %s25_s14, [#allocation5]  }
   0x7   :  { %s941_s1 = smov [#allocation8]   ;;  %s58_s21 = sshll.u32 %s1023_s4, 4  ;;  %s59_s21 = int_to_ptr.hbm [resolvable:$true] %s58_s21 }
   0x8   :  { %s45_s18 = sshll.u32 %s941_s1, 4  ;;  %s942_s22 = smov 128   ;;  %s46_s18 = int_to_ptr.vmem [resolvable:$true] %s45_s18 }
   0x9   :  { %s943_s0 = smov 8   ;;  %s944_s23 = smov [#allocation9]  }
   0xa   :  { %51 = dma.hbm_to_vmem [thread:$0]  %s44_s17, 512, %s46_s18, [#allocation7], %s942_s22, %s942_s22, %s943_s0  }
   0xb   :  { %s60_s24 = sshll.u32 %s944_s23, 4  ;;  %s61_s24 = int_to_ptr.vmem [resolvable:$true] %s60_s24 }
   0xc   :  { %66 = dma.hbm_to_vmem [thread:$0]  %s59_s21, 6144, %s61_s24, [#allocation10], %s942_s22, %s942_s22, %s943_s0  }
   0xd   :  { %933 = dma.done.wait [#allocation5], 128  }
   0xe   :  { %934 = vsyncadd [#allocation5], 4294967168 }
   0xf   :  { %935 = dma.done.wait [#allocation7], 640  }
  0x10   :  { %936 = vsyncadd [#allocation7], 4294966656 }
  0x11   :  { %937 = dma.done.wait [#allocation10], 6144  }
  0x12   :  { %938 = vsyncadd [#allocation10], 4294961152  ;;  %v579_v0 = vld [vmem:[#allocation8 + $0x10] sm:$0xf]  ;;  %v782_v1 = vld [vmem:[#allocation8 + $0x14] sm:$0xf0] }
  0x13   :  { %v781_v2 = vld [vmem:[#allocation8 + $0x14] sm:$0xf]  ;;  %v580_v3 = vor.u32 %v782_v1, %v579_v0  ;;  %v581_v4 = vld [vmem:[#allocation8 + $0x18] sm:$0xf0]  ;;  %v571_v5 = vld [vmem:[#allocation8] sm:$0xf] }
  0x14   :  { %v780_v6 = vld [vmem:[#allocation8 + $0x4] sm:$0xf0]  ;;  %v584_v7 = vor.u32 %v781_v2, %v581_v4  ;;  %v779_v8 = vld [vmem:[#allocation8 + $0x4] sm:$0xf]  ;;  %v573_v9 = vld [vmem:[#allocation8 + $0x8] sm:$0xf0] }
  0x15   :  { %v90_v10 = vld [vmem:[#allocation4] sm:$0xff]  ;;  %132 = vmatpush.bf16.msra.mxu0 %v580_v3  ;;  %v572_v11 = vor.u32 %v780_v6, %v571_v5  ;;  %v798_v13 = vld [vmem:[#allocation9 + $0x74] sm:$0xf0]  ;;  %v576_v15 = vor.u32 %v779_v8, %v573_v9  ;;  %v637_v18 = vld [vmem:[#allocation9 + $0x60] sm:$0xf]  ;;  %vm122_vm0 = vcmask 261120  }
  0x16   :  { %v645_v12 = vld [vmem:[#allocation9 + $0x70] sm:$0xf]  ;;  %145 = vmatpush.bf16.msra.mxu1 %v584_v7  ;;  %v814_v17 = vld [vmem:[#allocation9 + $0xf4] sm:$0xf0]  ;;  %v796_v19 = vld [vmem:[#allocation9 + $0x64] sm:$0xf0]  ;;  %v91_v23 = vpack.c.bf16 %v90_v10, %v90_v10 }
  0x17   :  { %v709_v14 = vld [vmem:[#allocation9 + $0xf0] sm:$0xf]  ;;  %v646_v16 = vor.u32 %v798_v13, %v645_v12  ;;  %v701_v21 = vld [vmem:[#allocation9 + $0xe0] sm:$0xf]  ;;  %v812_v22 = vld [vmem:[#allocation9 + $0xe4] sm:$0xf0]  ;;  %v638_v24 = vor.u32 %v796_v19, %v637_v18 }
  0x18   :  { %v710_v20 = vor.u32 %v814_v17, %v709_v14  ;;  %v702_v25 = vor.u32 %v812_v22, %v701_v21  ;;  %v629_v26 = vld [vmem:[#allocation9 + $0x50] sm:$0xf]  ;;  %v794_v27 = vld [vmem:[#allocation9 + $0x54] sm:$0xf0]  ;;  %v797_v30 = vld [vmem:[#allocation9 + $0x74] sm:$0xf] }
  0x19   :  { %466 = vmatpush.bf16.msra.mxu2 %v646_v16  ;;  %133 = vmatpush.bf16.msra.mxu0 %v572_v11  ;;  %v693_v28 = vld [vmem:[#allocation9 + $0xd0] sm:$0xf]  ;;  %v810_v29 = vld [vmem:[#allocation9 + $0xd4] sm:$0xf0]  ;;  %v647_v31 = vld [vmem:[#allocation9 + $0x78] sm:$0xf0]  ;;  %v630_v33 = vor.u32 %v794_v27, %v629_v26 }
  0x1a   :  { %479 = vmatpush.bf16.msra.mxu3 %v710_v20  ;;  %146 = vmatpush.bf16.msra.mxu1 %v576_v15  ;;  %v650_v32 = vor.u32 %v797_v30, %v647_v31  ;;  %v795_v34 = vld [vmem:[#allocation9 + $0x64] sm:$0xf]  ;;  %v639_v35 = vld [vmem:[#allocation9 + $0x68] sm:$0xf0]  ;;  %v694_v36 = vor.u32 %v810_v29, %v693_v28  ;;  %v621_v37 = vld [vmem:[#allocation9 + $0x40] sm:$0xf] }
  0x1b   :  { %v792_v38 = vld [vmem:[#allocation9 + $0x44] sm:$0xf0]  ;;  %v685_v39 = vld [vmem:[#allocation9 + $0xc0] sm:$0xf]  ;;  %v642_v41 = vor.u32 %v795_v34, %v639_v35  ;;  %v793_v42 = vld [vmem:[#allocation9 + $0x54] sm:$0xf] }
  0x1c   :  { %585 = vmatmul.msk.bf16.vlgmr.msra.gmra.mxu0 %vm122_vm0, %v91_v23  ;;  %v808_v40 = vld [vmem:[#allocation9 + $0xc4] sm:$0xf0]  ;;  %v631_v43 = vld [vmem:[#allocation9 + $0x58] sm:$0xf0]  ;;  %v773_v44 = vld [vmem:[#allocation9 + $0x170] sm:$0xf]  ;;  %v622_v46 = vor.u32 %v792_v38, %v621_v37 }
  0x1d   :  { %467 = vmatpush.bf16.msra.mxu2 %v638_v24  ;;  %586 = vmatmul.msk.bf16.vlgmr.msra.gmra.mxu1 %vm122_vm0, %v91_v23  ;;  %v830_v45 = vld [vmem:[#allocation9 + $0x174] sm:$0xf0]  ;;  %v686_v48 = vor.u32 %v808_v40, %v685_v39  ;;  %v613_v49 = vld [vmem:[#allocation9 + $0x30] sm:$0xf]  ;;  %v634_v53 = vor.u32 %v793_v42, %v631_v43  ;;  %v605_v56 = vld [vmem:[#allocation9 + $0x20] sm:$0xf] }
  0x1e   :  { %480 = vmatpush.bf16.msra.mxu3 %v702_v25  ;;  %505 = vmatpush.bf16.msrb.mxu1 %v650_v32  ;;  %v774_v47 = vor.u32 %v830_v45, %v773_v44  ;;  %v790_v50 = vld [vmem:[#allocation9 + $0x34] sm:$0xf0]  ;;  %v677_v51 = vld [vmem:[#allocation9 + $0xb0] sm:$0xf]  ;;  %v788_v57 = vld [vmem:[#allocation9 + $0x24] sm:$0xf0] }
  0x1f   :  { %v806_v52 = vld [vmem:[#allocation9 + $0xb4] sm:$0xf0]  ;;  %v614_v54 = vor.u32 %v790_v50, %v613_v49  ;;  %v669_v58 = vld [vmem:[#allocation9 + $0xa0] sm:$0xf]  ;;  %v804_v59 = vld [vmem:[#allocation9 + $0xa4] sm:$0xf0]  ;;  %v606_v60 = vor.u32 %v788_v57, %v605_v56 }
  0x20   :  { %492 = vmatpush.bf16.msrb.mxu0 %v774_v47  ;;  %v678_v55 = vor.u32 %v806_v52, %v677_v51  ;;  %v670_v61 = vor.u32 %v804_v59, %v669_v58  ;;  %v597_v62 = vld [vmem:[#allocation9 + $0x10] sm:$0xf]  ;;  %v786_v63 = vld [vmem:[#allocation9 + $0x14] sm:$0xf0]  ;;  %v791_v4 = vld [vmem:[#allocation9 + $0x44] sm:$0xf] }
  0x21   :  { %468 = vmatpush.bf16.msra.mxu2 %v630_v33  ;;  %v661_v0 = vld [vmem:[#allocation9 + $0x90] sm:$0xf]  ;;  %v802_v1 = vld [vmem:[#allocation9 + $0x94] sm:$0xf0]  ;;  %v598_v2 = vor.u32 %v786_v63, %v597_v62  ;;  %v623_v5 = vld [vmem:[#allocation9 + $0x48] sm:$0xf0] }
  0x22   :  { %481 = vmatpush.bf16.msra.mxu3 %v694_v36  ;;  %506 = vmatpush.bf16.msrb.mxu1 %v642_v41  ;;  %v662_v3 = vor.u32 %v802_v1, %v661_v0  ;;  %v626_v6 = vor.u32 %v791_v4, %v623_v5  ;;  %v765_v7 = vld [vmem:[#allocation9 + $0x160] sm:$0xf]  ;;  %v828_v8 = vld [vmem:[#allocation9 + $0x164] sm:$0xf0]  ;;  %v789_v15 = vld [vmem:[#allocation9 + $0x34] sm:$0xf] }
  0x23   :  { %v766_v9 = vor.u32 %v828_v8, %v765_v7  ;;  %v589_v10 = vld [vmem:[#allocation9] sm:$0xf]  ;;  %v784_v11 = vld [vmem:[#allocation9 + $0x4] sm:$0xf0]  ;;  %v615_v16 = vld [vmem:[#allocation9 + $0x38] sm:$0xf0] }
  0x24   :  { %v653_v12 = vld [vmem:[#allocation9 + $0x80] sm:$0xf]  ;;  %v590_v13 = vor.u32 %v784_v11, %v589_v10  ;;  %v800_v14 = vld [vmem:[#allocation9 + $0x84] sm:$0xf0]  ;;  %v618_v18 = vor.u32 %v789_v15, %v615_v16  ;;  %v813_v19 = vld [vmem:[#allocation9 + $0xf4] sm:$0xf] }
  0x25   :  { %469 = vmatpush.bf16.msra.mxu2 %v622_v46  ;;  %493 = vmatpush.bf16.msrb.mxu0 %v766_v9  ;;  %v654_v17 = vor.u32 %v800_v14, %v653_v12  ;;  %v711_v20 = vld [vmem:[#allocation9 + $0xf8] sm:$0xf0]  ;;  %v829_v21 = vld [vmem:[#allocation9 + $0x174] sm:$0xf]  ;;  %v757_v24 = vld [vmem:[#allocation9 + $0x150] sm:$0xf] }
  0x26   :  { %482 = vmatpush.bf16.msra.mxu3 %v686_v48  ;;  %507 = vmatpush.bf16.msrb.mxu1 %v634_v53  ;;  %v714_v22 = vor.u32 %v813_v19, %v711_v20  ;;  %v775_v23 = vld [vmem:[#allocation9 + $0x178] sm:$0xf0]  ;;  %v826_v25 = vld [vmem:[#allocation9 + $0x154] sm:$0xf0]  ;;  %v787_v28 = vld [vmem:[#allocation9 + $0x24] sm:$0xf] }
  0x27   :  { %v778_v26 = vor.u32 %v829_v21, %v775_v23  ;;  %v758_v27 = vor.u32 %v826_v25, %v757_v24  ;;  %v607_v29 = vld [vmem:[#allocation9 + $0x28] sm:$0xf0]  ;;  %v811_v30 = vld [vmem:[#allocation9 + $0xe4] sm:$0xf]  ;;  %v749_v37 = vld [vmem:[#allocation9 + $0x140] sm:$0xf] }
  0x28   :  { %v610_v31 = vor.u32 %v787_v28, %v607_v29  ;;  %v703_v32 = vld [vmem:[#allocation9 + $0xe8] sm:$0xf0]  ;;  %v827_v33 = vld [vmem:[#allocation9 + $0x164] sm:$0xf]  ;;  %v824_v38 = vld [vmem:[#allocation9 + $0x144] sm:$0xf0] }
  0x29   :  { %470 = vmatpush.bf16.msra.mxu2 %v614_v54  ;;  %494 = vmatpush.bf16.msrb.mxu0 %v758_v27  ;;  %v767_v34 = vld [vmem:[#allocation9 + $0x168] sm:$0xf0]  ;;  %v706_v35 = vor.u32 %v811_v30, %v703_v32  ;;  %v750_v39 = vor.u32 %v824_v38, %v749_v37  ;;  %v785_v40 = vld [vmem:[#allocation9 + $0x14] sm:$0xf]  ;;  %v599_v41 = vld [vmem:[#allocation9 + $0x18] sm:$0xf0] }
  0x2a   :  { %483 = vmatpush.bf16.msra.mxu3 %v678_v55  ;;  %508 = vmatpush.bf16.msrb.mxu1 %v626_v6  ;;  %v770_v36 = vor.u32 %v827_v33, %v767_v34  ;;  %v809_v42 = vld [vmem:[#allocation9 + $0xd4] sm:$0xf]  ;;  %v602_v43 = vor.u32 %v785_v40, %v599_v41  ;;  %v695_v44 = vld [vmem:[#allocation9 + $0xd8] sm:$0xf0]  ;;  %v741_v49 = vld [vmem:[#allocation9 + $0x130] sm:$0xf] }
  0x2b   :  { %v825_v45 = vld [vmem:[#allocation9 + $0x154] sm:$0xf]  ;;  %v759_v46 = vld [vmem:[#allocation9 + $0x158] sm:$0xf0]  ;;  %v698_v47 = vor.u32 %v809_v42, %v695_v44  ;;  %v822_v50 = vld [vmem:[#allocation9 + $0x134] sm:$0xf0] }
  0x2c   :  { %v762_v48 = vor.u32 %v825_v45, %v759_v46  ;;  %v742_v51 = vor.u32 %v822_v50, %v741_v49  ;;  %v783_v52 = vld [vmem:[#allocation9 + $0x4] sm:$0xf]  ;;  %v591_v53 = vld [vmem:[#allocation9 + $0x8] sm:$0xf0]  ;;  %v820_v62 = vld [vmem:[#allocation9 + $0x124] sm:$0xf0] }
  0x2d   :  { %471 = vmatpush.bf16.msra.mxu2 %v606_v60  ;;  %495 = vmatpush.bf16.msrb.mxu0 %v750_v39  ;;  %v807_v54 = vld [vmem:[#allocation9 + $0xc4] sm:$0xf]  ;;  %v594_v55 = vor.u32 %v783_v52, %v591_v53  ;;  %v687_v56 = vld [vmem:[#allocation9 + $0xc8] sm:$0xf0]  ;;  %v156_v63 = vld [vmem:[#allocation6] sm:$0xff]  ;;  %vm560_vm1 = vcmask 7168  }
  0x2e   :  { %484 = vmatpush.bf16.msra.mxu3 %v670_v61  ;;  %509 = vmatpush.bf16.msrb.mxu1 %v618_v18  ;;  %v823_v57 = vld [vmem:[#allocation9 + $0x144] sm:$0xf]  ;;  %v751_v58 = vld [vmem:[#allocation9 + $0x148] sm:$0xf0]  ;;  %v690_v59 = vor.u32 %v807_v54, %v687_v56  ;;  %v733_v61 = vld [vmem:[#allocation9 + $0x120] sm:$0xf]  ;;  %v157_v1 = vpack.c.bf16 %v156_v63, %v156_v63 }
  0x2f   :  { %v754_v60 = vor.u32 %v823_v57, %v751_v58  ;;  %v734_v0 = vor.u32 %v820_v62, %v733_v61  ;;  %v821_v4 = vld [vmem:[#allocation9 + $0x134] sm:$0xf]  ;;  %v743_v6 = vld [vmem:[#allocation9 + $0x138] sm:$0xf0]  ;;  %v725_v8 = vld [vmem:[#allocation9 + $0x110] sm:$0xf] }
  0x30   :  { %158 = vst [vmem:[#allocation2 + $0x8] sm:$0xf] %v157_v1  ;;  %v746_v7 = vor.u32 %v821_v4, %v743_v6  ;;  %v818_v9 = vld [vmem:[#allocation9 + $0x114] sm:$0xf0]  ;;  %v803_v10 = vld [vmem:[#allocation9 + $0xa4] sm:$0xf] }
  0x31   :  { %472 = vmatpush.bf16.msra.mxu2 %v598_v2  ;;  %496 = vmatpush.bf16.msrb.mxu0 %v742_v51  ;;  %v805_v2 = vld [vmem:[#allocation9 + $0xb4] sm:$0xf]  ;;  %v726_v11 = vor.u32 %v818_v9, %v725_v8  ;;  %v671_v12 = vld [vmem:[#allocation9 + $0xa8] sm:$0xf0]  ;;  %v816_v18 = vld [vmem:[#allocation9 + $0x104] sm:$0xf0] }
  0x32   :  { %485 = vmatpush.bf16.msra.mxu3 %v662_v3  ;;  %510 = vmatpush.bf16.msrb.mxu1 %v610_v31  ;;  %v679_v3 = vld [vmem:[#allocation9 + $0xb8] sm:$0xf0]  ;;  %v735_v14 = vld [vmem:[#allocation9 + $0x128] sm:$0xf0]  ;;  %v674_v15 = vor.u32 %v803_v10, %v671_v12  ;;  %v801_v19 = vld [vmem:[#allocation9 + $0x94] sm:$0xf] }
  0x33   :  { %v682_v5 = vor.u32 %v805_v2, %v679_v3  ;;  %v663_v21 = vld [vmem:[#allocation9 + $0x98] sm:$0xf0]  ;;  %v799_v27 = vld [vmem:[#allocation9 + $0x84] sm:$0xf]  ;;  %v655_v28 = vld [vmem:[#allocation9 + $0x88] sm:$0xf0] }
  0x34   :  { %v727_v23 = vld [vmem:[#allocation9 + $0x118] sm:$0xf0]  ;;  %v666_v24 = vor.u32 %v801_v19, %v663_v21  ;;  %v815_v30 = vld [vmem:[#allocation9 + $0x104] sm:$0xf]  ;;  %v719_v31 = vld [vmem:[#allocation9 + $0x108] sm:$0xf0]  ;;  %v658_v33 = vor.u32 %v799_v27, %v655_v28 }
  0x35   :  { %473 = vmatpush.bf16.msra.mxu2 %v590_v13  ;;  %497 = vmatpush.bf16.msrb.mxu0 %v734_v0  ;;  %v819_v13 = vld [vmem:[#allocation9 + $0x124] sm:$0xf]  ;;  %v722_v34 = vor.u32 %v815_v30, %v719_v31 }
  0x36   :  { %486 = vmatpush.bf16.msra.mxu3 %v654_v17  ;;  %511 = vmatpush.bf16.msrb.mxu1 %v602_v43  ;;  %v738_v16 = vor.u32 %v819_v13, %v735_v14  ;;  %v717_v17 = vld [vmem:[#allocation9 + $0x100] sm:$0xf]  ;;  %v209_v56 = vld [vmem:[%s1024_s5] sm:$0x3] }
  0x37   :  { %v718_v20 = vor.u32 %v816_v18, %v717_v17  ;;  %v211_v57 = vperm.slane %v209_v56, 0  ;;  %v212_v62 = vperm.slane %v209_v56, 1  ;;  %v546_v4 = vld [vmem:[%s1025_s6] sm:$0x3] }
  0x38   :  { %v548_v8 = vperm.slane %v546_v4, 0  ;;  %v549_v9 = vperm.slane %v546_v4, 1 }
  0x39   :  { %518 = vmatpush.bf16.msrb.mxu2 %v714_v22  ;;  %498 = vmatpush.bf16.msrb.mxu0 %v726_v11  ;;  %v817_v22 = vld [vmem:[#allocation9 + $0x114] sm:$0xf] }
  0x3a   :  { %531 = vmatpush.bf16.msrb.mxu3 %v778_v26  ;;  %512 = vmatpush.bf16.msrb.mxu1 %v594_v55  ;;  %v730_v25 = vor.u32 %v817_v22, %v727_v23  ;;  %v160_v26 = vld [vmem:[#allocation2 + $0x8] sm:$0xf] }
  0x3b   :  { %v219_v29 = vunpack.c.l.b16 %v160_v26 }
  0x3d   :  { %519 = vmatpush.bf16.msrb.mxu2 %v706_v35  ;;  %499 = vmatpush.bf16.msrb.mxu0 %v718_v20  ;;  %v222_v32 = vpack.c.b16 %v219_v29, %v219_v29  ;;  %v96_v35 = vld [vmem:[%s1022_s3] sm:$0x3] }
  0x3e   :  { %532 = vmatpush.bf16.msrb.mxu3 %v770_v36  ;;  %v98_v36 = vperm.slane %v96_v35, 0  ;;  %v99_v37 = vperm.slane %v96_v35, 1 }
  0x40   :  { %500 = vmatmul.bf16.vlgmr.msrb.gmra.mxu0 %v222_v32 }
  0x41   :  { %520 = vmatpush.bf16.msrb.mxu2 %v698_v47 }
  0x42   :  { %533 = vmatpush.bf16.msrb.mxu3 %v762_v48 }
  0x45   :  { %521 = vmatpush.bf16.msrb.mxu2 %v690_v59 }
  0x46   :  { %534 = vmatpush.bf16.msrb.mxu3 %v754_v60 }
  0x49   :  { %522 = vmatpush.bf16.msrb.mxu2 %v682_v5 }
  0x4a   :  { %535 = vmatpush.bf16.msrb.mxu3 %v746_v7 }
  0x4d   :  { %523 = vmatpush.bf16.msrb.mxu2 %v674_v15 }
  0x4e   :  { %536 = vmatpush.bf16.msrb.mxu3 %v738_v16  ;;  %v558_v16 = vstv %s1026_s7 }
  0x51   :  { %524 = vmatpush.bf16.msrb.mxu2 %v666_v24 }
  0x52   :  { %537 = vmatpush.bf16.msrb.mxu3 %v730_v25 }
  0x55   :  { %525 = vmatpush.bf16.msrb.mxu2 %v658_v33 }
  0x56   :  { %538 = vmatpush.bf16.msrb.mxu3 %v722_v34 }
  0x99   :  { %v135_v38 = vpop.f32.mrf.mxu0 }
  0x9a   :  { %v136_v39 = vadd.f32 %v135_v38, %v98_v36  ;;  %v148_v40 = vpop.f32.mrf.mxu1 }
  0x9b   :  { %v149_v41 = vadd.f32 %v148_v40, %v99_v37 }
  0x9c   :  { %v152_v42 = vmax.f32 %v136_v39, 0.0 }
  0x9d   :  { %v153_v43 = vmax.f32 %v149_v41, 0.0 }
  0x9f   :  { %v154_v44 = vpack.c.bf16 %v153_v43, %v152_v42 }
  0xa1   :  { %v137_v45 = vpop.f32.mrf.mxu0  ;;  %v217_v46 = vunpack.c.l.b16 %v154_v44  ;;  %v218_v47 = vunpack.c.h.b16 %v154_v44 }
  0xa2   :  { %v150_v48 = vpop.f32.mrf.mxu1 }
  0xa3   :  { %v220_v49 = vpack.c.b16 %v217_v46, %v217_v46  ;;  %v221_v50 = vpack.c.b16 %v218_v47, %v218_v47 }
  0xa5   :  { %474 = vmatmul.bf16.vlgmr.msra.gmra.mxu2 %v220_v49  ;;  %487 = vmatmul.bf16.vlgmr.msra.gmra.mxu3 %v221_v50 }
  0xa6   :  { %513 = vmatmul.bf16.vlgmr.msrb.gmra.mxu1 %v220_v49 }
  0xb5   :  { %526 = vmatmul.bf16.vlgmr.msrb.gmra.mxu2 %v221_v50  ;;  %539 = vmatmul.bf16.vlgmr.msrb.gmra.mxu3 %v222_v32 }
  0xbd   :  { %v501_v51 = vpop.f32.mrf.mxu0 }
  0xc5   :  { %v503_v52 = vpop.f32.mrf.mxu0 }
 0x123   :  { %v514_v53 = vpop.f32.mrf.mxu1 }
 0x124   :  { %v515_v0 = vadd.f32 %v514_v53, %v212_v62 }
 0x128   :  { %v475_v54 = vpop.f32.mrf.mxu2  ;;  %v488_v55 = vpop.f32.mrf.mxu3 }
 0x129   :  { %v476_v59 = vadd.f32 %v475_v54, %v211_v57 }
 0x12b   :  { %v516_v58 = vpop.f32.mrf.mxu1  ;;  %v489_v63 = vadd.f32 %v488_v55, %v476_v59 }
 0x12d   :  { %v502_v1 = vadd.f32 %v501_v51, %v489_v63 }
 0x12f   :  { %v544_v6 = vmax.f32 %v502_v1, 0.0 }
 0x130   :  { %v477_v60 = vpop.f32.mrf.mxu2  ;;  %v490_v61 = vpop.f32.mrf.mxu3 }
 0x131   :  { %v552_v11 = vmul.f32 %v548_v8, %v544_v6 }
 0x138   :  { %v527_v2 = vpop.f32.mrf.mxu2  ;;  %v540_v3 = vpop.f32.mrf.mxu3 }
 0x139   :  { %v528_v5 = vadd.f32 %v527_v2, %v515_v0 }
 0x13b   :  { %v541_v7 = vadd.f32 %v540_v3, %v528_v5 }
 0x13d   :  { %v545_v10 = vmax.f32 %v541_v7, 0.0 }
 0x13f   :  { %v553_v12 = vmul.f32 %v549_v9, %v545_v10 }
 0x140   :  { %v529_v13 = vpop.f32.mrf.mxu2  ;;  %v542_v14 = vpop.f32.mrf.mxu3 }
 0x141   :  { %v554_v15 = vadd.f32 %v553_v12, %v552_v11 }
 0x143   :  { %555 = vadd.xlane.f32.xlu0 %v554_v15 }
 0x1b6   :  { %v556_v17 = vpop.xlane.xlu0 %555 }
 0x1b7   :  { %v559_v18 = vadd.f32 %v558_v16, %v556_v17 }
 0x1b9   :  { %561 = vst.msk [vmem:[%s1027_s8] sm:$0xff] %vm560_vm1, %v559_v18 }
 0x1ba   :  { %566 = vsyncpa [#allocation5], 1 }
 0x1bb   :  { %567 = vsyncpa [#allocation7], 1 }
 0x1bc   :  { %568 = vsyncpa [#allocation10], 1 }

</bundles_post_ra>
